<compile_context>
chip_gen: v5e
topology: v5e:2x2
jax: 0.10.0
libtpu: 0.0.40
codegen_flags: <defaults>
</compile_context>

<pallas_src>
import functools

import jax
import jax.numpy as jnp
from jax.experimental import pallas as pl
from jax.experimental.pallas import tpu as pltpu


def ag_kernel(g_ref, w_ref, alpha_ref, cos_ref, *, inv_temperature,
              num_layers, num_op):
    # g_ref: (B, D); w_ref: (num_layers * num_op, D)  -- all layers resident.
    g = g_ref[...].astype(jnp.float32)
    w = w_ref[...].astype(jnp.float32)

    # Row-normalize every layer's op embedding at once (rsqrt -> EUP slot).
    inv_norm = jax.lax.rsqrt(jnp.sum(w * w, axis=-1, keepdims=True))
    o = w * inv_norm                                        # (L*num_op, D)

    # cosloss = sum_l sum_{i,j} o_li . o_lj = sum_l || sum_i o_li ||^2
    row_idx = jax.lax.broadcasted_iota(jnp.int32, o.shape, 0)
    cos = jnp.zeros((1, 1), jnp.float32)
    for l in range(num_layers):                             # static unroll
        in_layer = jnp.logical_and(row_idx >= l * num_op,
                                   row_idx < (l + 1) * num_op)
        s_l = jnp.sum(jnp.where(in_layer, o, 0.0), axis=0, keepdims=True)
        cos = cos + jnp.sum(s_l * s_l, keepdims=True)       # stays (1, 1)
    cos_ref[...] = cos

    # One MXU launch for all layers: (B, D) x (D, L*num_op).
    logits = jax.lax.dot_general(
        g, o, (((1,), (1,)), ((), ())),
        preferred_element_type=jnp.float32) * inv_temperature  # (B, L*num_op)

    # Per-layer (segmented) softmax + threshold-at-1/6 + renormalize, computed
    # on the full-width tile with disjoint lane-group masks (no slicing/concat).
    col_idx = jax.lax.broadcasted_iota(jnp.int32, logits.shape, 1)
    alpha = jnp.zeros_like(logits)
    for l in range(num_layers):                             # static unroll
        in_group = jnp.logical_and(col_idx >= l * num_op,
                                   col_idx < (l + 1) * num_op)
        masked = jnp.where(in_group, logits, -jnp.inf)
        m = jnp.max(masked, axis=1, keepdims=True)
        e = jnp.exp(masked - m)                             # 0 outside group
        se = jnp.sum(e, axis=1, keepdims=True)
        keep = e > se * (1.0 / 6.0)                         # == softmax > 1/6
        em = jnp.where(keep, e, 0.0)
        inv_den = pl.reciprocal(jnp.sum(em, axis=1, keepdims=True))  # exact
        alpha = alpha + em * inv_den                        # disjoint supports
    alpha_ref[...] = alpha                                  # single dense store


def ag_forward(g, weights, temperature):
    """g: (B, D) f32; weights: (num_layers, num_op, D) f32 (only the layers
    actually used in AG.forward). Returns (list of (B, num_op) alphas,
    cosloss of shape (1,))."""
    num_layers, num_op, d = weights.shape
    b = g.shape[0]
    w_flat = weights.reshape(num_layers * num_op, d)

    alpha_flat, cosloss = pl.pallas_call(
        functools.partial(
            ag_kernel,
            inv_temperature=1.0 / float(temperature),
            num_layers=num_layers,
            num_op=num_op),
        out_shape=(
            jax.ShapeDtypeStruct((b, num_layers * num_op), jnp.float32),
            jax.ShapeDtypeStruct((1, 1), jnp.float32),
        ),
        in_specs=[
            pl.BlockSpec(memory_space=pltpu.MemorySpace.VMEM),
            pl.BlockSpec(memory_space=pltpu.MemorySpace.VMEM),
        ],
        out_specs=(
            pl.BlockSpec(memory_space=pltpu.MemorySpace.VMEM),
            pl.BlockSpec(memory_space=pltpu.MemorySpace.VMEM),
        ),
    )(g, w_flat)

    alphas = [alpha_flat[:, i * num_op:(i + 1) * num_op]
              for i in range(num_layers)]
    return alphas, cosloss.reshape(1)


def ag_reference(g, weights, temperature):
    """Pure-JAX reference mirroring the PyTorch AG.forward."""
    alphas = []
    cosloss = jnp.zeros((1,), jnp.float32)
    for w in weights:
        o = w / jnp.linalg.norm(w, axis=-1, keepdims=True)
        cosloss = cosloss + jnp.sum(o @ o.T)
        a = jax.nn.softmax((g @ o.T) / temperature, axis=1)
        a = a * (a > 1.0 / 6.0)
        a = a / jnp.sum(a, axis=1, keepdims=True)
        alphas.append(a)
    return alphas, cosloss


if __name__ == "__main__":
    # Synthetic "args": num_layers=3, graph_dim=32, temperature=0.2; num_op=6.
    num_layers, graph_dim, temperature = 3, 32, 0.2
    num_op, batch = 6, 8

    key = jax.random.PRNGKey(0)
    kg, kw = jax.random.split(key)
    g = jax.random.normal(kg, (batch, graph_dim), dtype=jnp.float32)

    # AG.__init__ builds num_layers + 1 embedding tables (N(0,1) init, like
    # nn.Embedding); forward only uses the first num_layers of them.
    all_weights = jax.random.normal(
        kw, (num_layers + 1, num_op, graph_dim), dtype=jnp.float32)
    used_weights = all_weights[:num_layers]

    alphas, cosloss = ag_forward(g, used_weights, temperature)
    jax.block_until_ready(cosloss)
    for a in alphas:
        jax.block_until_ready(a)

    # Correctness check against the pure-JAX reference.
    ref_alphas, ref_cosloss = ag_reference(g, used_weights, temperature)
    assert jnp.allclose(cosloss, ref_cosloss, rtol=1e-5, atol=1e-5)
    for a, ra in zip(alphas, ref_alphas):
        assert jnp.allclose(a, ra, rtol=1e-5, atol=1e-5)
        assert jnp.allclose(jnp.sum(a, axis=1), 1.0, rtol=1e-5, atol=1e-5)

    print("KERNEL_OK")
</pallas_src>

<mosaic_0001>
module attributes {stable_mosaic.version = 11 : i64} {
  func.func @ag_kernel(%arg0: memref<8x32xf32, #tpu.memory_space<vmem>>, %arg1: memref<18x32xf32, #tpu.memory_space<vmem>>, %arg2: memref<8x18xf32, #tpu.memory_space<vmem>>, %arg3: memref<1x1xf32, #tpu.memory_space<vmem>>) attributes {dimension_semantics = [], scalar_prefetch = 0 : i64, scratch_operands = 0 : i64, tpu.core_type = #tpu.core_type<tc>} {
    %c0 = arith.constant 0 : index
    %c0_0 = arith.constant 0 : index
    %0 = vector.load %arg0[%c0, %c0_0] : memref<8x32xf32, #tpu.memory_space<vmem>>, vector<8x32xf32>
    %c0_1 = arith.constant 0 : index
    %c0_2 = arith.constant 0 : index
    %1 = vector.load %arg1[%c0_1, %c0_2] : memref<18x32xf32, #tpu.memory_space<vmem>>, vector<18x32xf32>
    %2 = arith.mulf %1, %1 : vector<18x32xf32>
    %cst = arith.constant dense<0.000000e+00> : vector<18xf32>
    %3 = vector.multi_reduction <add>, %2, %cst [1] : vector<18x32xf32> to vector<18xf32>
    %4 = vector.shape_cast %3 : vector<18xf32> to vector<18x1xf32>
    %5 = math.rsqrt %4 : vector<18x1xf32>
    %6 = vector.broadcast %5 : vector<18x1xf32> to vector<18x32xf32>
    %7 = arith.mulf %1, %6 : vector<18x32xf32>
    %8 = tpu.iota {dimensions = array<i32: 0>} : vector<18x32xi32>
    %cst_3 = arith.constant 0.000000e+00 : f32
    %9 = vector.broadcast %cst_3 : f32 to vector<1x1xf32>
    %c0_i32 = arith.constant 0 : i32
    %10 = vector.broadcast %c0_i32 : i32 to vector<18x32xi32>
    %11 = arith.cmpi sge, %8, %10 : vector<18x32xi32>
    %c6_i32 = arith.constant 6 : i32
    %12 = vector.broadcast %c6_i32 : i32 to vector<18x32xi32>
    %13 = arith.cmpi slt, %8, %12 : vector<18x32xi32>
    %14 = arith.andi %11, %13 : vector<18x32xi1>
    %cst_4 = arith.constant 0.000000e+00 : f32
    %15 = vector.broadcast %cst_4 : f32 to vector<18x32xf32>
    %16 = arith.select %14, %7, %15 : vector<18x32xi1>, vector<18x32xf32>
    %cst_5 = arith.constant dense<0.000000e+00> : vector<32xf32>
    %17 = vector.multi_reduction <add>, %16, %cst_5 [0] : vector<18x32xf32> to vector<32xf32>
    %18 = vector.shape_cast %17 : vector<32xf32> to vector<1x32xf32>
    %19 = arith.mulf %18, %18 : vector<1x32xf32>
    %20 = vector.shape_cast %19 : vector<1x32xf32> to vector<1x1x32xf32>
    %cst_6 = arith.constant dense<0.000000e+00> : vector<1xf32>
    %21 = vector.multi_reduction <add>, %20, %cst_6 [1, 2] : vector<1x1x32xf32> to vector<1xf32>
    %22 = vector.shape_cast %21 : vector<1xf32> to vector<1x1x1xf32>
    %23 = vector.extract %22[0, 0, 0] : f32 from vector<1x1x1xf32>
    %24 = vector.broadcast %23 : f32 to vector<1x1xf32>
    %25 = arith.addf %9, %24 : vector<1x1xf32>
    %c6_i32_7 = arith.constant 6 : i32
    %26 = vector.broadcast %c6_i32_7 : i32 to vector<18x32xi32>
    %27 = arith.cmpi sge, %8, %26 : vector<18x32xi32>
    %c12_i32 = arith.constant 12 : i32
    %28 = vector.broadcast %c12_i32 : i32 to vector<18x32xi32>
    %29 = arith.cmpi slt, %8, %28 : vector<18x32xi32>
    %30 = arith.andi %27, %29 : vector<18x32xi1>
    %cst_8 = arith.constant 0.000000e+00 : f32
    %31 = vector.broadcast %cst_8 : f32 to vector<18x32xf32>
    %32 = arith.select %30, %7, %31 : vector<18x32xi1>, vector<18x32xf32>
    %cst_9 = arith.constant dense<0.000000e+00> : vector<32xf32>
    %33 = vector.multi_reduction <add>, %32, %cst_9 [0] : vector<18x32xf32> to vector<32xf32>
    %34 = vector.shape_cast %33 : vector<32xf32> to vector<1x32xf32>
    %35 = arith.mulf %34, %34 : vector<1x32xf32>
    %36 = vector.shape_cast %35 : vector<1x32xf32> to vector<1x1x32xf32>
    %cst_10 = arith.constant dense<0.000000e+00> : vector<1xf32>
    %37 = vector.multi_reduction <add>, %36, %cst_10 [1, 2] : vector<1x1x32xf32> to vector<1xf32>
    %38 = vector.shape_cast %37 : vector<1xf32> to vector<1x1x1xf32>
    %39 = vector.extract %38[0, 0, 0] : f32 from vector<1x1x1xf32>
    %40 = vector.broadcast %39 : f32 to vector<1x1xf32>
    %41 = arith.addf %25, %40 : vector<1x1xf32>
    %c12_i32_11 = arith.constant 12 : i32
    %42 = vector.broadcast %c12_i32_11 : i32 to vector<18x32xi32>
    %43 = arith.cmpi sge, %8, %42 : vector<18x32xi32>
    %c18_i32 = arith.constant 18 : i32
    %44 = vector.broadcast %c18_i32 : i32 to vector<18x32xi32>
    %45 = arith.cmpi slt, %8, %44 : vector<18x32xi32>
    %46 = arith.andi %43, %45 : vector<18x32xi1>
    %cst_12 = arith.constant 0.000000e+00 : f32
    %47 = vector.broadcast %cst_12 : f32 to vector<18x32xf32>
    %48 = arith.select %46, %7, %47 : vector<18x32xi1>, vector<18x32xf32>
    %cst_13 = arith.constant dense<0.000000e+00> : vector<32xf32>
    %49 = vector.multi_reduction <add>, %48, %cst_13 [0] : vector<18x32xf32> to vector<32xf32>
    %50 = vector.shape_cast %49 : vector<32xf32> to vector<1x32xf32>
    %51 = arith.mulf %50, %50 : vector<1x32xf32>
    %52 = vector.shape_cast %51 : vector<1x32xf32> to vector<1x1x32xf32>
    %cst_14 = arith.constant dense<0.000000e+00> : vector<1xf32>
    %53 = vector.multi_reduction <add>, %52, %cst_14 [1, 2] : vector<1x1x32xf32> to vector<1xf32>
    %54 = vector.shape_cast %53 : vector<1xf32> to vector<1x1x1xf32>
    %55 = vector.extract %54[0, 0, 0] : f32 from vector<1x1x1xf32>
    %56 = vector.broadcast %55 : f32 to vector<1x1xf32>
    %57 = arith.addf %41, %56 : vector<1x1xf32>
    %c0_15 = arith.constant 0 : index
    %c0_16 = arith.constant 0 : index
    %58 = vector.load %arg3[%c0_15, %c0_16] : memref<1x1xf32, #tpu.memory_space<vmem>>, vector<1x1xf32>
    tpu.vector_store %arg3[%c0_15, %c0_16], %57 {strides = array<i32>} : memref<1x1xf32, #tpu.memory_space<vmem>>, vector<1x1xf32>,
    %cst_17 = arith.constant dense<0.000000e+00> : vector<8x18xf32>
    %59 = tpu.matmul %0, %7, %cst_17 {dimension_numbers = #tpu.dot_dimension_numbers<[1], [1], [0], [0], [0, 0, 1, 0], [], []>} : vector<8x32xf32>, vector<18x32xf32>, vector<8x18xf32> -> vector<8x18xf32>
    %cst_18 = arith.constant 5.000000e+00 : f32
    %60 = vector.broadcast %cst_18 : f32 to vector<8x18xf32>
    %61 = arith.mulf %59, %60 : vector<8x18xf32>
    %62 = tpu.iota {dimensions = array<i32: 1>} : vector<8x18xi32>
    %cst_19 = arith.constant 0.000000e+00 : f32
    %63 = vector.broadcast %cst_19 : f32 to vector<8x18xf32>
    %c0_i32_20 = arith.constant 0 : i32
    %64 = vector.broadcast %c0_i32_20 : i32 to vector<8x18xi32>
    %65 = arith.cmpi sge, %62, %64 : vector<8x18xi32>
    %c6_i32_21 = arith.constant 6 : i32
    %66 = vector.broadcast %c6_i32_21 : i32 to vector<8x18xi32>
    %67 = arith.cmpi slt, %62, %66 : vector<8x18xi32>
    %68 = arith.andi %65, %67 : vector<8x18xi1>
    %cst_22 = arith.constant 0xFF800000 : f32
    %69 = vector.broadcast %cst_22 : f32 to vector<8x18xf32>
    %70 = arith.select %68, %61, %69 : vector<8x18xi1>, vector<8x18xf32>
    %cst_23 = arith.constant dense<0xFF800000> : vector<8xf32>
    %71 = vector.multi_reduction <maximumf>, %70, %cst_23 [1] : vector<8x18xf32> to vector<8xf32>
    %72 = vector.shape_cast %71 : vector<8xf32> to vector<8x1xf32>
    %73 = vector.broadcast %72 : vector<8x1xf32> to vector<8x18xf32>
    %74 = arith.subf %70, %73 : vector<8x18xf32>
    %75 = math.exp %74 : vector<8x18xf32>
    %cst_24 = arith.constant dense<0.000000e+00> : vector<8xf32>
    %76 = vector.multi_reduction <add>, %75, %cst_24 [1] : vector<8x18xf32> to vector<8xf32>
    %77 = vector.shape_cast %76 : vector<8xf32> to vector<8x1xf32>
    %cst_25 = arith.constant 0.166666672 : f32
    %78 = vector.broadcast %cst_25 : f32 to vector<8x1xf32>
    %79 = arith.mulf %77, %78 : vector<8x1xf32>
    %80 = vector.broadcast %79 : vector<8x1xf32> to vector<8x18xf32>
    %81 = arith.cmpf ogt, %75, %80 : vector<8x18xf32>
    %cst_26 = arith.constant 0.000000e+00 : f32
    %82 = vector.broadcast %cst_26 : f32 to vector<8x18xf32>
    %83 = arith.select %81, %75, %82 : vector<8x18xi1>, vector<8x18xf32>
    %cst_27 = arith.constant dense<0.000000e+00> : vector<8xf32>
    %84 = vector.multi_reduction <add>, %83, %cst_27 [1] : vector<8x18xf32> to vector<8xf32>
    %85 = vector.shape_cast %84 : vector<8xf32> to vector<8x1xf32>
    %86 = tpu.reciprocal %85 : vector<8x1xf32> -> vector<8x1xf32>
    %87 = vector.broadcast %86 : vector<8x1xf32> to vector<8x18xf32>
    %88 = arith.mulf %83, %87 : vector<8x18xf32>
    %89 = arith.addf %63, %88 : vector<8x18xf32>
    %c6_i32_28 = arith.constant 6 : i32
    %90 = vector.broadcast %c6_i32_28 : i32 to vector<8x18xi32>
    %91 = arith.cmpi sge, %62, %90 : vector<8x18xi32>
    %c12_i32_29 = arith.constant 12 : i32
    %92 = vector.broadcast %c12_i32_29 : i32 to vector<8x18xi32>
    %93 = arith.cmpi slt, %62, %92 : vector<8x18xi32>
    %94 = arith.andi %91, %93 : vector<8x18xi1>
    %cst_30 = arith.constant 0xFF800000 : f32
    %95 = vector.broadcast %cst_30 : f32 to vector<8x18xf32>
    %96 = arith.select %94, %61, %95 : vector<8x18xi1>, vector<8x18xf32>
    %cst_31 = arith.constant dense<0xFF800000> : vector<8xf32>
    %97 = vector.multi_reduction <maximumf>, %96, %cst_31 [1] : vector<8x18xf32> to vector<8xf32>
    %98 = vector.shape_cast %97 : vector<8xf32> to vector<8x1xf32>
    %99 = vector.broadcast %98 : vector<8x1xf32> to vector<8x18xf32>
    %100 = arith.subf %96, %99 : vector<8x18xf32>
    %101 = math.exp %100 : vector<8x18xf32>
    %cst_32 = arith.constant dense<0.000000e+00> : vector<8xf32>
    %102 = vector.multi_reduction <add>, %101, %cst_32 [1] : vector<8x18xf32> to vector<8xf32>
    %103 = vector.shape_cast %102 : vector<8xf32> to vector<8x1xf32>
    %cst_33 = arith.constant 0.166666672 : f32
    %104 = vector.broadcast %cst_33 : f32 to vector<8x1xf32>
    %105 = arith.mulf %103, %104 : vector<8x1xf32>
    %106 = vector.broadcast %105 : vector<8x1xf32> to vector<8x18xf32>
    %107 = arith.cmpf ogt, %101, %106 : vector<8x18xf32>
    %cst_34 = arith.constant 0.000000e+00 : f32
    %108 = vector.broadcast %cst_34 : f32 to vector<8x18xf32>
    %109 = arith.select %107, %101, %108 : vector<8x18xi1>, vector<8x18xf32>
    %cst_35 = arith.constant dense<0.000000e+00> : vector<8xf32>
    %110 = vector.multi_reduction <add>, %109, %cst_35 [1] : vector<8x18xf32> to vector<8xf32>
    %111 = vector.shape_cast %110 : vector<8xf32> to vector<8x1xf32>
    %112 = tpu.reciprocal %111 : vector<8x1xf32> -> vector<8x1xf32>
    %113 = vector.broadcast %112 : vector<8x1xf32> to vector<8x18xf32>
    %114 = arith.mulf %109, %113 : vector<8x18xf32>
    %115 = arith.addf %89, %114 : vector<8x18xf32>
    %c12_i32_36 = arith.constant 12 : i32
    %116 = vector.broadcast %c12_i32_36 : i32 to vector<8x18xi32>
    %117 = arith.cmpi sge, %62, %116 : vector<8x18xi32>
    %c18_i32_37 = arith.constant 18 : i32
    %118 = vector.broadcast %c18_i32_37 : i32 to vector<8x18xi32>
    %119 = arith.cmpi slt, %62, %118 : vector<8x18xi32>
    %120 = arith.andi %117, %119 : vector<8x18xi1>
    %cst_38 = arith.constant 0xFF800000 : f32
    %121 = vector.broadcast %cst_38 : f32 to vector<8x18xf32>
    %122 = arith.select %120, %61, %121 : vector<8x18xi1>, vector<8x18xf32>
    %cst_39 = arith.constant dense<0xFF800000> : vector<8xf32>
    %123 = vector.multi_reduction <maximumf>, %122, %cst_39 [1] : vector<8x18xf32> to vector<8xf32>
    %124 = vector.shape_cast %123 : vector<8xf32> to vector<8x1xf32>
    %125 = vector.broadcast %124 : vector<8x1xf32> to vector<8x18xf32>
    %126 = arith.subf %122, %125 : vector<8x18xf32>
    %127 = math.exp %126 : vector<8x18xf32>
    %cst_40 = arith.constant dense<0.000000e+00> : vector<8xf32>
    %128 = vector.multi_reduction <add>, %127, %cst_40 [1] : vector<8x18xf32> to vector<8xf32>
    %129 = vector.shape_cast %128 : vector<8xf32> to vector<8x1xf32>
    %cst_41 = arith.constant 0.166666672 : f32
    %130 = vector.broadcast %cst_41 : f32 to vector<8x1xf32>
    %131 = arith.mulf %129, %130 : vector<8x1xf32>
    %132 = vector.broadcast %131 : vector<8x1xf32> to vector<8x18xf32>
    %133 = arith.cmpf ogt, %127, %132 : vector<8x18xf32>
    %cst_42 = arith.constant 0.000000e+00 : f32
    %134 = vector.broadcast %cst_42 : f32 to vector<8x18xf32>
    %135 = arith.select %133, %127, %134 : vector<8x18xi1>, vector<8x18xf32>
    %cst_43 = arith.constant dense<0.000000e+00> : vector<8xf32>
    %136 = vector.multi_reduction <add>, %135, %cst_43 [1] : vector<8x18xf32> to vector<8xf32>
    %137 = vector.shape_cast %136 : vector<8xf32> to vector<8x1xf32>
    %138 = tpu.reciprocal %137 : vector<8x1xf32> -> vector<8x1xf32>
    %139 = vector.broadcast %138 : vector<8x1xf32> to vector<8x18xf32>
    %140 = arith.mulf %135, %139 : vector<8x18xf32>
    %141 = arith.addf %115, %140 : vector<8x18xf32>
    %c0_44 = arith.constant 0 : index
    %c0_45 = arith.constant 0 : index
    %142 = vector.load %arg2[%c0_44, %c0_45] : memref<8x18xf32, #tpu.memory_space<vmem>>, vector<8x18xf32>
    tpu.vector_store %arg2[%c0_44, %c0_45], %141 {strides = array<i32>} : memref<8x18xf32, #tpu.memory_space<vmem>>, vector<8x18xf32>,
    return
  }
}

</mosaic_0001>

<bundles_post_ra>
// kernel: tpu_custom_call.1
= control target key start
LH: loop header
LB: loop body
LE: loop exit
PB: predicated region body
PF: predicated region fallthrough
CT: control target
= control target key end

     0   :  { %9 = vsyncpa [#allocation3], 0  ;;  %s603_s0 = inlined_call_operand.hbm [shape: f32[8,32], index: 0, kind: input, shape index: {}]   ;;  %s604_s1 = inlined_call_operand.hbm [shape: f32[18,32], index: 1, kind: input, shape index: {}]   ;;  %s605_s2 = inlined_call_operand.hbm [shape: f32[8,18], index: 2, kind: output, shape index: {0}]   ;;  %s606_s3 = inlined_call_operand.hbm [shape: f32[1,1], index: 3, kind: output, shape index: {1}]  }
   0x1   :  { %10 = vsyncpa [#allocation6], 0 }
   0x2   :  { %11 = vsyncpa [#allocation4], 0 }
   0x3   :  { %12 = vsyncpa [#allocation9], 0  ;;  %s18_s14 = sshll.u32 %s603_s0, 4  ;;  %s525_s15 = smov [#allocation2]   ;;  %s19_s14 = int_to_ptr.hbm [resolvable:$true] %s18_s14 }
   0x4   :  { %s20_s16 = sshll.u32 %s525_s15, 4  ;;  %s28_s19 = sshll.u32 %s604_s1, 4  ;;  %s21_s16 = int_to_ptr.vmem [resolvable:$true] %s20_s16  ;;  %s29_s19 = int_to_ptr.hbm [resolvable:$true] %s28_s19 }
   0x5   :  { %23 = dma.hbm_to_vmem [thread:$0]  %s19_s14, 128, %s21_s16, [#allocation3]  }
   0x6   :  { %s526_s20 = smov [#allocation5]   ;;  %s527_s22 = smov 128  }
   0x7   :  { %s30_s21 = sshll.u32 %s526_s20, 4  ;;  %s528_s23 = smov 8   ;;  %s31_s21 = int_to_ptr.vmem [resolvable:$true] %s30_s21 }
   0x8   :  { %36 = dma.hbm_to_vmem [thread:$0]  %s29_s19, 384, %s31_s21, [#allocation6], %s527_s22, %s527_s22, %s528_s23  }
   0x9   :  { %517 = dma.done.wait [#allocation3], 128  }
   0xa   :  { %518 = vsyncadd [#allocation3], 4294967168 }
   0xb   :  { %519 = dma.done.wait [#allocation6], 384  }
   0xc   :  { %520 = vsyncadd [#allocation6], 4294966912  ;;  %v48_v0 = vld [vmem:[#allocation5 + $0x10] sm:$0x3]  ;;  %vm59_vm0 = vcmask 254976   ;;  %v46_v1 = vld [vmem:[#allocation5] sm:$0xff]  ;;  %v96_v19 = vlaneseq }
   0xd   :  { %vm52_vm1 = vcmask 261120   ;;  %v51_v2 = vmul.f32 %v48_v0, %v48_v0  ;;  %v49_v3 = vmul.f32 %v46_v1, %v46_v1  ;;  %v47_v4 = vld [vmem:[#allocation5 + $0x8] sm:$0xff]  ;;  %v45_v50 = vld [vmem:[#allocation2] sm:$0xff]  ;;  %vm124_vm15 = vcmask 253952   ;;  %s529_s24 = smov [#allocation8]   ;;  %s371_s29 = sshll.u32 %s606_s3, 4  ;;  %s372_s29 = int_to_ptr.hbm [resolvable:$true] %s371_s29 }
   0xe   :  { %v50_v7 = vmul.f32 %v47_v4, %v47_v4  ;;  %v97_v26 = vshrl.u32 %v96_v19, 7  ;;  %v245_v62 = vand.u32 127, %v96_v19  ;;  %s369_s25 = sshll.u32 %s529_s24, 4  ;;  %s530_s3 = smov [#allocation7]   ;;  %s370_s25 = int_to_ptr.vmem [resolvable:$true] %s369_s25 }
   0xf   :  { %v60_v5 = vsel %vm59_vm0, %v51_v2, 0.0  ;;  %v53_v6 = vsel %vm52_vm1, %v49_v3, 0.0  ;;  %s358_s30 = sshll.u32 %s530_s3, 4  ;;  %s360_s6 = sshll.u32 %s605_s2, 4  ;;  %s359_s30 = int_to_ptr.vmem [resolvable:$true] %s358_s30  ;;  %s361_s6 = int_to_ptr.hbm [resolvable:$true] %s360_s6 }
  0x10   :  { %61 = vadd.xlane.f32.xlu0 %v60_v5  ;;  %54 = vadd.xlane.f32.xlu1 %v53_v6  ;;  %v56_v8 = vsel %vm52_vm1, %v50_v7, 0.0  ;;  %vm137_vm8 = vcmp.ge.s32.totalorder %v97_v26, 6  ;;  %v99_v33 = vadd.s32 16, %v97_v26  ;;  %v98_v36 = vadd.s32 8, %v97_v26 }
  0x12   :  { %vm178_vm11 = vcmp.lt.s32.totalorder %v99_v33, 18  ;;  %vm141_vm13 = vcmp.lt.s32.totalorder %v98_v36, 12  ;;  %vm174_vm14 = vcmp.ge.s32.totalorder %v98_v36, 12 }
  0x18   :  { %57 = vadd.xlane.f32.xlu0 %v56_v8 }
  0x83   :  { %v62_v9 = vpop.xlane.xlu0 %61  ;;  %v55_v10 = vpop.xlane.xlu1 %54 }
  0x84   :  { %403 = vrsqrt.f32 %v62_v9  ;;  %vm69_vm3 = vweird.f32 %v55_v10  ;;  %vm89_vm5 = vweird.f32 %v62_v9 }
  0x85   :  { %405 = vrsqrt.f32 %v55_v10 }
  0x8a   :  { %v404_v11 = vpop.eup %403 }
  0x8b   :  { %v406_v12 = vpop.eup %405  ;;  %v84_v13 = vmul.f32 %v404_v11, %v62_v9  ;;  %v58_v14 = vpop.xlane.xlu0 %57  ;;  %vm90_vm2 = vweird.f32 %v404_v11 }
  0x8c   :  { %v64_v15 = vmul.f32 %v406_v12, %v55_v10  ;;  %407 = vrsqrt.f32 %v58_v14  ;;  %vm70_vm4 = vweird.f32 %v406_v12  ;;  %vm91_vm6 = vmor %vm89_vm5, %vm90_vm2  ;;  %vm79_vm10 = vweird.f32 %v58_v14 }
  0x8d   :  { %v85_v16 = vmul.f32 %v404_v11, %v84_v13  ;;  %vm71_vm7 = vmor %vm69_vm3, %vm70_vm4  ;;  %vm282_vm2 = vcmp.ge.s32.totalorder %v245_v62, 6  ;;  %vm283_vm3 = vcmp.lt.s32.totalorder %v245_v62, 12  ;;  %vm247_vm5 = vcmp.lt.s32.totalorder %v245_v62, 6 }
  0x8e   :  { %v65_v17 = vmul.f32 %v406_v12, %v64_v15  ;;  %vm284_vm4 = vmand %vm282_vm2, %vm283_vm3 }
  0x8f   :  { %v86_v18 = vmul.f32 0.5, %v85_v16 }
  0x90   :  { %v66_v20 = vmul.f32 0.5, %v65_v17 }
  0x91   :  { %v87_v21 = vsub.f32 1.5, %v86_v18 }
  0x92   :  { %v408_v22 = vpop.eup %407  ;;  %v67_v23 = vsub.f32 1.5, %v66_v20 }
  0x93   :  { %v74_v24 = vmul.f32 %v408_v22, %v58_v14  ;;  %v88_v25 = vmul.f32 %v404_v11, %v87_v21  ;;  %vm80_vm9 = vweird.f32 %v408_v22 }
  0x94   :  { %v68_v27 = vmul.f32 %v406_v12, %v67_v23  ;;  %vm81_vm12 = vmor %vm79_vm10, %vm80_vm9 }
  0x95   :  { %v75_v28 = vmul.f32 %v408_v22, %v74_v24  ;;  %v92_v29 = vsel %vm91_vm6, %v404_v11, %v88_v25  ;;  %vm250_vm6 = vcmask 146432  }
  0x96   :  { %v95_v30 = vmul.f32 %v92_v29, %v48_v0  ;;  %v72_v31 = vsel %vm71_vm7, %v406_v12, %v68_v27  ;;  %vm317_vm7 = vcmp.ge.s32.totalorder %v245_v62, 12 }
  0x97   :  { %v76_v32 = vmul.f32 0.5, %v75_v28  ;;  %v93_v34 = vmul.f32 %v72_v31, %v46_v1 }
  0x98   :  { %387 = vmatpush.xpose.msk.msra.mxu0 %vm52_vm1, %v95_v30  ;;  %v184_v40 = vsel %vm178_vm11, %v95_v30, 0.0 }
  0x99   :  { %v77_v35 = vsub.f32 1.5, %v76_v32  ;;  %v146_v37 = vsel %vm137_vm8, %v93_v34, 0.0  ;;  %v188_v44 = vsel %vm59_vm0, %v184_v40, 0.0  ;;  %vm103_vm0 = vcmp.lt.s32.totalorder %v97_v26, 6 }
  0x9a   :  { %v149_v47 = vsel %vm52_vm1, %v146_v37, 0.0  ;;  %v109_v59 = vsel %vm103_vm0, %v93_v34, 0.0  ;;  %vm318_vm8 = vcmp.lt.s32.totalorder %v245_v62, 18 }
  0x9b   :  { %v78_v38 = vmul.f32 %v408_v22, %v77_v35  ;;  %v112_v60 = vsel %vm52_vm1, %v109_v59, 0.0 }
  0x9c   :  { %v117_v61 = vrot.slane %v112_v60, 4 }
  0x9d   :  { %v82_v39 = vsel %vm81_vm12, %v408_v22, %v78_v38  ;;  %vm209_vm12 = vcmask 0  }
  0x9e   :  { %v94_v41 = vmul.f32 %v82_v39, %v47_v4  ;;  %v118_v63 = vadd.f32 %v117_v61, %v112_v60 }
  0xa0   :  { %v147_v42 = vsel %vm141_vm13, %v94_v41, 0.0  ;;  %v183_v43 = vsel %vm174_vm14, %v94_v41, 0.0  ;;  %388 = vmatpush.xpose.msk.msra.mxu0 %vm52_vm1, %v94_v41  ;;  %v119_v1 = vrot.slane %v118_v63, 2 }
  0xa1   :  { %v150_v45 = vsel %vm52_vm1, %v147_v42, 0.0  ;;  %v186_v46 = vsel %vm52_vm1, %v183_v43, 0.0 }
  0xa2   :  { %v189_v48 = vadd.f32 %v188_v44, %v186_v46  ;;  %v151_v49 = vadd.f32 %v150_v45, %v149_v47  ;;  %v120_v8 = vadd.f32 %v119_v1, %v118_v63 }
  0xa4   :  { %389 = vmatpush.xpose.msk.msra.mxu0 %vm52_vm1, %v93_v34  ;;  %v154_v51 = vrot.slane %v151_v49, 4  ;;  %v190_v2 = vrot.slane %v189_v48, 4  ;;  %v121_v10 = vrot.slane %v120_v8, 1 }
  0xa6   :  { %v155_v52 = vadd.f32 %v154_v51, %v151_v49  ;;  %v191_v9 = vadd.f32 %v190_v2, %v189_v48  ;;  %v122_v14 = vadd.f32 %v121_v10, %v120_v8 }
  0xa7   :  { %390 = vmatmul.msk.f32.vlgmr.msra.gmra.mxu0 %vm52_vm1, %v45_v50  ;;  %vm319_vm1 = vmand %vm317_vm7, %vm318_vm8 }
  0xa8   :  { %v156_v53 = vrot.slane %v155_v52, 2  ;;  %v192_v11 = vrot.slane %v191_v9, 2  ;;  %v123_v16 = vmul.f32 %v122_v14, %v122_v14 }
  0xaa   :  { %v157_v54 = vadd.f32 %v156_v53, %v155_v52  ;;  %v193_v15 = vadd.f32 %v192_v11, %v191_v9  ;;  %v125_v18 = vsel %vm124_vm15, %v123_v16, 0.0 }
  0xac   :  { %v158_v55 = vrot.slane %v157_v54, 1  ;;  %v194_v17 = vrot.slane %v193_v15, 1 }
  0xae   :  { %v159_v56 = vadd.f32 %v158_v55, %v157_v54  ;;  %v195_v19 = vadd.f32 %v194_v17, %v193_v15 }
  0xb0   :  { %v160_v57 = vmul.f32 %v159_v56, %v159_v56  ;;  %v196_v20 = vmul.f32 %v195_v19, %v195_v19 }
  0xb2   :  { %v569_v58 = vsel %vm124_vm15, %v160_v57, 0.0  ;;  %v197_v21 = vsel %vm124_vm15, %v196_v20, 0.0 }
 0x124   :  { %v240_v0 = vpop.f32.mrf.mxu0 }
 0x125   :  { %v243_v3 = vmul.f32 5.0, %v240_v0 }
 0x127   :  { %v285_v4 = vsel %vm284_vm4, %v243_v3, -inf  ;;  %v249_v5 = vsel %vm247_vm5, %v243_v3, -inf  ;;  %v320_v12 = vsel %vm319_vm1, %v243_v3, -inf }
 0x128   :  { %v286_v6 = vsel %vm250_vm6, %v285_v4, -inf  ;;  %v251_v7 = vsel %vm250_vm6, %v249_v5, -inf  ;;  %v321_v13 = vsel %vm250_vm6, %v320_v12, -inf }
 0x129   :  { %287 = vmax.xlane.f32.xlu2 %v286_v6  ;;  %252 = vmax.xlane.f32.xlu1 %v251_v7 }
 0x131   :  { %322 = vmax.xlane.f32.xlu2 %v321_v13 }
 0x139   :  { %126 = vadd.xlane.f32.xlu2 %v125_v18 }
 0x141   :  { %198 = vadd.xlane.f32.xlu2 %v197_v21 }
 0x19c   :  { %v288_v22 = vpop.xlane.xlu2 %287  ;;  %v253_v23 = vpop.xlane.xlu1 %252 }
 0x19d   :  { %v289_v24 = vsub.f32 %v285_v4, %v288_v22  ;;  %v254_v25 = vsub.f32 %v249_v5, %v253_v23 }
 0x19f   :  { %v290_v26 = vmul.f32 1.442695, %v289_v24  ;;  %v255_v27 = vmul.f32 1.442695, %v254_v25 }
 0x1a1   :  { %409 = vpow2.f32 %v290_v26 }
 0x1a2   :  { %411 = vpow2.f32 %v255_v27 }
 0x1a4   :  { %v323_v28 = vpop.xlane.xlu2 %322 }
 0x1a5   :  { %v324_v29 = vsub.f32 %v320_v12, %v323_v28 }
 0x1a7   :  { %v410_v30 = vpop.eup %409  ;;  %v325_v31 = vmul.f32 1.442695, %v324_v29 }
 0x1a8   :  { %v412_v32 = vpop.eup %411  ;;  %v292_v33 = vsel %vm250_vm6, %v410_v30, 0.0 }
 0x1a9   :  { %413 = vpow2.f32 %v325_v31  ;;  %293 = vadd.xlane.f32.xlu1 %v292_v33  ;;  %v257_v34 = vsel %vm250_vm6, %v412_v32, 0.0 }
 0x1aa   :  { %258 = vadd.xlane.f32.xlu0 %v257_v34 }
 0x1ac   :  { %v127_v35 = vpop.xlane.xlu2 %126 }
 0x1ad   :  { %v128_v36 = vrot.slane %v127_v35, 4 }
 0x1af   :  { %v414_v37 = vpop.eup %413  ;;  %v129_v38 = vadd.f32 %v128_v36, %v127_v35 }
 0x1b0   :  { %v327_v39 = vsel %vm250_vm6, %v414_v37, 0.0 }
 0x1b1   :  { %v130_v40 = vrot.slane %v129_v38, 2  ;;  %328 = vadd.xlane.f32.xlu1 %v327_v39 }
 0x1b2   :  { %162 = vadd.xlane.f32.xlu0 %v569_v58 }
 0x1b3   :  { %v131_v41 = vadd.f32 %v130_v40, %v129_v38 }
 0x1b4   :  { %v199_v44 = vpop.xlane.xlu2 %198 }
 0x1b5   :  { %v132_v42 = vrot.slane %v131_v41, 1  ;;  %v200_v46 = vrot.slane %v199_v44, 4 }
 0x1b7   :  { %v133_v43 = vadd.f32 %v132_v42, %v131_v41  ;;  %v201_v51 = vadd.f32 %v200_v46, %v199_v44 }
 0x1b9   :  { %391 = vpush %v133_v43  ;;  %v202_v56 = vrot.slane %v201_v51, 2 }
 0x1bb   :  { %v203_v63 = vadd.f32 %v202_v56, %v201_v51 }
 0x1bd   :  { %v204_v2 = vrot.slane %v203_v63, 1 }
 0x1bf   :  { %v205_v5 = vadd.f32 %v204_v2, %v203_v63 }
 0x1ea   :  { %s392_s0 = spop %391 }
 0x1eb   :  { %v135_v6 = vstv %s392_s0 }
 0x21c   :  { %v294_v45 = vpop.xlane.xlu1 %293 }
 0x21d   :  { %v259_v47 = vpop.xlane.xlu0 %258  ;;  %v295_v48 = vmul.f32 0.16666667, %v294_v45 }
 0x21e   :  { %v260_v49 = vmul.f32 0.16666667, %v259_v47 }
 0x21f   :  { %vm296_vm9 = vcmp.gt.f32.partialorder %v410_v30, %v295_v48 }
 0x220   :  { %vm261_vm10 = vcmp.gt.f32.partialorder %v412_v32, %v260_v49  ;;  %v581_v50 = vsel %vm296_vm9, %v410_v30, 0.0 }
 0x221   :  { %v583_v52 = vsel %vm261_vm10, %v412_v32, 0.0  ;;  %v298_v53 = vsel %vm250_vm6, %v581_v50, 0.0 }
 0x222   :  { %v263_v54 = vsel %vm250_vm6, %v583_v52, 0.0  ;;  %299 = vadd.xlane.f32.xlu1 %v298_v53 }
 0x223   :  { %264 = vadd.xlane.f32.xlu0 %v263_v54 }
 0x224   :  { %v329_v55 = vpop.xlane.xlu1 %328 }
 0x225   :  { %v163_v57 = vpop.xlane.xlu0 %162  ;;  %v330_v58 = vmul.f32 0.16666667, %v329_v55 }
 0x226   :  { %v164_v59 = vrot.slane %v163_v57, 4 }
 0x227   :  { %vm331_vm11 = vcmp.gt.f32.partialorder %v414_v37, %v330_v58 }
 0x228   :  { %v165_v60 = vadd.f32 %v164_v59, %v163_v57  ;;  %v589_v61 = vsel %vm331_vm11, %v414_v37, 0.0 }
 0x229   :  { %v333_v62 = vsel %vm250_vm6, %v589_v61, 0.0 }
 0x22a   :  { %v166_v0 = vrot.slane %v165_v60, 2  ;;  %334 = vadd.xlane.f32.xlu2 %v333_v62 }
 0x22c   :  { %v167_v1 = vadd.f32 %v166_v0, %v165_v60 }
 0x22e   :  { %v168_v3 = vrot.slane %v167_v1, 1 }
 0x230   :  { %v169_v4 = vadd.f32 %v168_v3, %v167_v1 }
 0x232   :  { %393 = vpush %v169_v4 }
 0x233   :  { %395 = vpush %v205_v5 }
 0x263   :  { %s394_s1 = spop %393 }
 0x264   :  { %v171_v7 = vstv %s394_s1  ;;  %s396_s26 = spop %395 }
 0x265   :  { %v172_v8 = vadd.f32 %v171_v7, %v135_v6  ;;  %v207_v9 = vstv %s396_s26 }
 0x267   :  { %v208_v10 = vadd.f32 %v207_v9, %v172_v8 }
 0x269   :  { %210 = vst.msk [vmem:[#allocation8] sm:$0x1] %vm209_vm12, %v208_v10 }
 0x26a   :  { %374 = dma.vmem_to_hbm [thread:$0]  %s370_s25, 16, %s372_s29, [#allocation9]  }
 0x295   :  { %v300_v11 = vpop.xlane.xlu1 %299 }
 0x296   :  { %v265_v12 = vpop.xlane.xlu0 %264  ;;  %415 = vrcp.f32 %v300_v11  ;;  %v312_v23 = vand.u32 2147483648, %v300_v11  ;;  %vm306_vm15 = vweird.f32 %v300_v11  ;;  %v310_v26 = vand.u32 2147483647, %v300_v11 }
 0x297   :  { %417 = vrcp.f32 %v265_v12  ;;  %v277_v22 = vand.u32 2147483648, %v265_v12  ;;  %v275_v24 = vand.u32 2147483647, %v265_v12  ;;  %vm271_vm0 = vweird.f32 %v265_v12 }
 0x298   :  { %v313_v33 = vor.u32 1.1754944e-38, %v312_v23  ;;  %vm311_vm5 = vcmp.eq.f32.partialorder %v310_v26, 8.507059e+37 }
 0x299   :  { %v278_v32 = vor.u32 1.1754944e-38, %v277_v22  ;;  %vm276_vm4 = vcmp.eq.f32.partialorder %v275_v24, 8.507059e+37 }
 0x29c   :  { %v416_v13 = vpop.eup %415 }
 0x29d   :  { %v418_v14 = vpop.eup %417  ;;  %v302_v15 = vmul.f32 %v416_v13, %v300_v11  ;;  %v335_v16 = vpop.xlane.xlu2 %334  ;;  %vm307_vm13 = vweird.f32 %v416_v13 }
 0x29e   :  { %v267_v17 = vmul.f32 %v418_v14, %v265_v12  ;;  %419 = vrcp.f32 %v335_v16  ;;  %vm272_vm14 = vweird.f32 %v418_v14  ;;  %vm308_vm2 = vmor %vm306_vm15, %vm307_vm13  ;;  %v347_v37 = vand.u32 2147483648, %v335_v16 }
 0x29f   :  { %v303_v18 = vsub.f32 1.0, %v302_v15  ;;  %vm273_vm3 = vmor %vm271_vm0, %vm272_vm14  ;;  %v345_v39 = vand.u32 2147483647, %v335_v16  ;;  %vm341_vm8 = vweird.f32 %v335_v16 }
 0x2a0   :  { %v268_v19 = vsub.f32 1.0, %v267_v17  ;;  %v348_v43 = vor.u32 1.1754944e-38, %v347_v37 }
 0x2a1   :  { %v304_v20 = vmul.f32 %v416_v13, %v303_v18  ;;  %vm346_vm9 = vcmp.eq.f32.partialorder %v345_v39, 8.507059e+37 }
 0x2a2   :  { %v269_v21 = vmul.f32 %v418_v14, %v268_v19 }
 0x2a3   :  { %v305_v25 = vadd.f32 %v416_v13, %v304_v20 }
 0x2a4   :  { %v420_v27 = vpop.eup %419  ;;  %v270_v28 = vadd.f32 %v418_v14, %v269_v21 }
 0x2a5   :  { %v309_v29 = vsel %vm308_vm2, %v416_v13, %v305_v25  ;;  %v337_v30 = vmul.f32 %v420_v27, %v335_v16  ;;  %vm342_vm7 = vweird.f32 %v420_v27 }
 0x2a6   :  { %v274_v31 = vsel %vm273_vm3, %v418_v14, %v270_v28  ;;  %v314_v36 = vsel %vm311_vm5, %v313_v33, %v309_v29  ;;  %vm343_vm1 = vmor %vm341_vm8, %vm342_vm7 }
 0x2a7   :  { %v338_v34 = vsub.f32 1.0, %v337_v30  ;;  %v279_v35 = vsel %vm276_vm4, %v278_v32, %v274_v31  ;;  %v315_v41 = vmul.f32 %v314_v36, %v581_v50 }
 0x2a8   :  { %v280_v40 = vmul.f32 %v279_v35, %v583_v52 }
 0x2a9   :  { %v339_v38 = vmul.f32 %v420_v27, %v338_v34 }
 0x2aa   :  { %v316_v47 = vadd.f32 %v315_v41, %v280_v40 }
 0x2ab   :  { %v340_v42 = vadd.f32 %v420_v27, %v339_v38 }
 0x2ad   :  { %v344_v44 = vsel %vm343_vm1, %v420_v27, %v340_v42 }
 0x2ae   :  { %v349_v45 = vsel %vm346_vm9, %v348_v43, %v344_v44 }
 0x2af   :  { %v350_v46 = vmul.f32 %v349_v45, %v589_v61 }
 0x2b1   :  { %v351_v48 = vadd.f32 %v350_v46, %v316_v47 }
 0x2b3   :  { %352 = vst.msk [vmem:[#allocation7] sm:$0xff] %vm250_vm6, %v351_v48 }
 0x2b4   :  { %363 = dma.vmem_to_hbm [thread:$0]  %s359_s30, 128, %s361_s6, [#allocation4]  }
 0x2b5   :  { %521 = dma.done.wait [#allocation4], 128  }
 0x2b6   :  { %522 = vsyncadd [#allocation4], 4294967168 }
 0x2b7   :  { %523 = dma.done.wait [#allocation9], 16  }
 0x2b8   :  { %524 = vsyncadd [#allocation9], 4294967280 }
 0x2b9   :  { %383 = vsyncpa [#allocation3], 1 }
 0x2ba   :  { %384 = vsyncpa [#allocation6], 1 }
 0x2bb   :  { %385 = vsyncpa [#allocation4], 1 }
 0x2bc   :  { %386 = vsyncpa [#allocation9], 1 }

</bundles_post_ra>
